<compile_context>
chip_gen: v7x
topology: tpu7x:2x2x1
jax: 0.10.0
libtpu: 0.0.40
codegen_flags: <defaults>
</compile_context>

<pallas_src>
import jax
import jax.numpy as jnp
from jax import lax
from jax.experimental import pallas as pl
from jax.experimental.pallas import tpu as pltpu


def nsb1_kernel(x_ref, wt_ref, o_ref):
    x = x_ref[...]            # (B, D_in), native dtype into the MXU
    wt = wt_ref[...]          # (D_in, H), pre-transposed (K, N) layout

    # Linear without bias (bias cancels under softmax over dim=0).
    # Plain NN contraction: x dim 1 with w dim 0 -> (B, H), f32 accumulate.
    y = lax.dot_general(
        x, wt,
        dimension_numbers=(((1,), (0,)), ((), ())),
        preferred_element_type=jnp.float32,
    )

    # Numerically-stable softmax over axis 0 (the batch axis), in f32.
    m = jnp.max(y, axis=0, keepdims=True)        # (1, H)
    e = jnp.exp(y - m)                           # (B, H)
    s = jnp.sum(e, axis=0, keepdims=True)        # (1, H)
    # approx=False -> exact divide path (not the approximate EUP vrcp);
    # required to stay well inside the 1e-5 tolerance.
    inv = pl.reciprocal(s, approx=False)
    o_ref[...] = (e * inv).astype(o_ref.dtype)


@jax.jit
def nsb1_forward(x, w_t):
    """softmax(x @ w_t, axis=0) with w_t = w.T (pre-transposed at setup time).

    nn.Linear's bias is mathematically a no-op under softmax over dim=0, so it
    is never passed into the kernel."""
    B, _ = x.shape
    H = w_t.shape[1]
    return pl.pallas_call(
        nsb1_kernel,
        out_shape=jax.ShapeDtypeStruct((B, H), x.dtype),
        in_specs=[
            pl.BlockSpec(memory_space=pltpu.MemorySpace.VMEM),
            pl.BlockSpec(memory_space=pltpu.MemorySpace.VMEM),
        ],
        out_specs=pl.BlockSpec(memory_space=pltpu.MemorySpace.VMEM),
    )(x, w_t)


def nsb1_init_params(key, input_size, hidden_size, dtype=jnp.float32):
    """One-time parameter setup (nn.Linear-style uniform init).

    Returns (w, b) in PyTorch layout plus w_t = w.T in MXU-preferred (K, N)
    layout; the transpose happens here, outside the per-call hot path."""
    k_w, k_b = jax.random.split(key)
    bound = 1.0 / (input_size ** 0.5)
    w = jax.random.uniform(k_w, (hidden_size, input_size),
                           minval=-bound, maxval=bound, dtype=dtype)
    b = jax.random.uniform(k_b, (hidden_size,),
                           minval=-bound, maxval=bound, dtype=dtype)
    w_t = jnp.asarray(w.T)        # (D_in, H), materialized once at setup time
    return w, b, w_t


def nsb1_reference(x, w, b):
    # Full PyTorch semantics (bias included) for the correctness check.
    y = x @ w.T + b[None, :]
    y = y - jnp.max(y, axis=0, keepdims=True)
    e = jnp.exp(y)
    return e / jnp.sum(e, axis=0, keepdims=True)


if __name__ == "__main__":
    key = jax.random.PRNGKey(0)
    k_x, k_p = jax.random.split(key)

    batch = 8
    input_size = 32
    hidden_size = 32

    x = jax.random.normal(k_x, (batch, input_size), dtype=jnp.float32)
    w, b, w_t = nsb1_init_params(k_p, input_size, hidden_size)
    w_t = jax.block_until_ready(w_t)   # setup cost paid before the forward

    out = nsb1_forward(x, w_t)
    out = jax.block_until_ready(out)

    ref = nsb1_reference(x, w, b)
    assert out.shape == (batch, hidden_size)
    assert jnp.allclose(out, ref, atol=1e-5, rtol=1e-5), "mismatch vs reference"

    print("KERNEL_OK")
</pallas_src>

<mosaic_0001>
module attributes {stable_mosaic.version = 11 : i64} {
  func.func @nsb1_kernel(%arg0: memref<8x32xf32, #tpu.memory_space<vmem>>, %arg1: memref<32x32xf32, #tpu.memory_space<vmem>>, %arg2: memref<8x32xf32, #tpu.memory_space<vmem>>) attributes {dimension_semantics = [], scalar_prefetch = 0 : i64, scratch_operands = 0 : i64, tpu.core_type = #tpu.core_type<tc>} {
    %c0 = arith.constant 0 : index
    %c0_0 = arith.constant 0 : index
    %0 = vector.load %arg0[%c0, %c0_0] : memref<8x32xf32, #tpu.memory_space<vmem>>, vector<8x32xf32>
    %c0_1 = arith.constant 0 : index
    %c0_2 = arith.constant 0 : index
    %1 = vector.load %arg1[%c0_1, %c0_2] : memref<32x32xf32, #tpu.memory_space<vmem>>, vector<32x32xf32>
    %cst = arith.constant dense<0.000000e+00> : vector<8x32xf32>
    %2 = tpu.matmul %0, %1, %cst {dimension_numbers = #tpu.dot_dimension_numbers<[1], [0], [0], [1], [0, 0, 1, 1], [], []>} : vector<8x32xf32>, vector<32x32xf32>, vector<8x32xf32> -> vector<8x32xf32>
    %cst_3 = arith.constant dense<0xFF800000> : vector<32xf32>
    %3 = vector.multi_reduction <maximumf>, %2, %cst_3 [0] : vector<8x32xf32> to vector<32xf32>
    %4 = vector.shape_cast %3 : vector<32xf32> to vector<1x32xf32>
    %5 = vector.broadcast %4 : vector<1x32xf32> to vector<8x32xf32>
    %6 = arith.subf %2, %5 : vector<8x32xf32>
    %7 = math.exp %6 : vector<8x32xf32>
    %cst_4 = arith.constant dense<0.000000e+00> : vector<32xf32>
    %8 = vector.multi_reduction <add>, %7, %cst_4 [0] : vector<8x32xf32> to vector<32xf32>
    %9 = vector.shape_cast %8 : vector<32xf32> to vector<1x32xf32>
    %10 = tpu.reciprocal %9 : vector<1x32xf32> -> vector<1x32xf32>
    %11 = vector.broadcast %10 : vector<1x32xf32> to vector<8x32xf32>
    %12 = arith.mulf %7, %11 : vector<8x32xf32>
    %c0_5 = arith.constant 0 : index
    %c0_6 = arith.constant 0 : index
    %13 = vector.load %arg2[%c0_5, %c0_6] : memref<8x32xf32, #tpu.memory_space<vmem>>, vector<8x32xf32>
    tpu.vector_store %arg2[%c0_5, %c0_6], %12 {strides = array<i32>} : memref<8x32xf32, #tpu.memory_space<vmem>>, vector<8x32xf32>,
    return
  }
}

</mosaic_0001>

<bundles_post_ra>
// kernel: nsb1_forward.1
= control target key start
LH: loop header
LB: loop body
LE: loop exit
PB: predicated region body
PF: predicated region fallthrough
CT: control target
= control target key end

     0   :  { %7 = vsyncpa [#allocation3], 0  ;;  %s330_s0 = inlined_call_operand.hbm [shape: f32[8,32], index: 0, kind: input, shape index: {}]   ;;  %s331_s1 = inlined_call_operand.hbm [shape: f32[32,32], index: 1, kind: input, shape index: {}]   ;;  %s332_s2 = inlined_call_operand.hbm [shape: f32[8,32], index: 2, kind: output, shape index: {}]  }
   0x1   :  { %8 = vsyncpa [#allocation6], 0 }
   0x2   :  { %9 = vsyncpa [#allocation4], 0  ;;  %s260_s9 = smov [#allocation2]   ;;  %s261_s11 = smov [#allocation5]  }
   0x3   :  { %s16_s10 = sshll.u32 %s260_s9, 4  ;;  %s25_s12 = sshll.u32 %s261_s11, 4  ;;  %s17_s10 = int_to_ptr.vmem [resolvable:$true] %s16_s10  ;;  %s283_s12 = int_to_ptr.vmem [resolvable:$true] %s25_s12 }
   0x4   :  { %s188_s15 = scalar_lea.hbm %s330_s0, 128 }
   0x5   :  { %p189_p0 = scmp.ne.s32.totalorder %s330_s0, %s188_s15  ;;  %p192_p1 = scmp.lt.u32.totalorder %s188_s15, %s330_s0 }
   0x7   :  { %p194_p2 = pnand %p192_p1, %p189_p0 }
   0x9   :  { %197 = shalt.err (!%p194_p2)
}
   0xa   :  { %s198_s20 = scalar_lea.vmem %s17_s10, 128  ;;  %p203_p4 = scmp.lt.s32.totalorder %s17_s10, %s17_s10 }
   0xb   :  { %p199_p3 = scmp.ne.s32.totalorder %s17_s10, %s198_s20  ;;  %p204_p5 = scmp.lt.s32.totalorder %s198_s20, %s198_s20 }
   0xd   :  { %p205_p6 = por %p204_p5, %p203_p4 }
   0xf   :  { %p206_p7 = pnand %p205_p6, %p199_p3 }
  0x11   :  { %209 = shalt.err (!%p206_p7)
}
  0x12   :  { %19 = dma.hbm_to_vmem [thread:$0]  %s330_s0, 128, %s17_s10, [#allocation3]  }
  0x13   :  { %s210_s25 = scalar_lea.hbm %s331_s1, 512 }
  0x14   :  { %p211_p8 = scmp.ne.s32.totalorder %s331_s1, %s210_s25  ;;  %p214_p9 = scmp.lt.u32.totalorder %s210_s25, %s331_s1 }
  0x16   :  { %p216_p10 = pnand %p214_p9, %p211_p8 }
  0x18   :  { %219 = shalt.err (!%p216_p10)
}
  0x19   :  { %s220_s30 = scalar_lea.vmem %s283_s12, 512  ;;  %p225_p12 = scmp.lt.s32.totalorder %s283_s12, %s283_s12 }
  0x1a   :  { %p221_p11 = scmp.ne.s32.totalorder %s283_s12, %s220_s30  ;;  %p226_p13 = scmp.lt.s32.totalorder %s220_s30, %s220_s30 }
  0x1c   :  { %p227_p0 = por %p226_p13, %p225_p12 }
  0x1e   :  { %p228_p1 = pnand %p227_p0, %p221_p11 }
  0x20   :  { %231 = shalt.err (!%p228_p1)
}
  0x21   :  { %s262_s0 = smov 128   ;;  %s263_s3 = smov 8  }
  0x22   :  { %31 = dma.hbm_to_vmem [thread:$0]  %s331_s1, 512, %s283_s12, [#allocation6], %s262_s0, %s262_s0, %s263_s3  }
  0x23   :  { %254 = dma.done.wait [#allocation3], 128  }
  0x24   :  { %255 = vsyncadd [#allocation3], 4294967168 }
  0x25   :  { %256 = dma.done.wait [#allocation6], 512  }
  0x26   :  { %257 = vsyncadd [#allocation6], 4294966784  ;;  %v264_v0 = vmov 0.0|0.0   ;;  %vm265_vm0 = vmmov 0   ;;  %v266_v1 = vmov 0.0   ;;  %v39_v2 = vld [vmem:[#allocation5] sm:$0xff] }
  0x27   :  { %170 = vmatprep.subr.bf16.mxu0 %v264_v0  ;;  %167 = vmatprep.mubr.msk.f32.mxu0 %vm265_vm0, %v266_v1  ;;  %v40_v3 = vld [vmem:[#allocation5 + $0x8] sm:$0xff]  ;;  %v41_v4 = vld [vmem:[#allocation5 + $0x10] sm:$0xff]  ;;  %v42_v6 = vld [vmem:[#allocation5 + $0x18] sm:$0xff]  ;;  %vm43_vm1 = vcmask 261120   ;;  %s267_s1 = smov [#allocation7]  }
  0x28   :  { %v171_v5 = vpack.c.bf16 %v40_v3, %v39_v2  ;;  %v174_v7 = vpack.c.bf16 %v42_v6, %v41_v4  ;;  %v38_v8 = vld [vmem:[#allocation2] sm:$0xff]  ;;  %s143_s6 = sshll.u32 %s267_s1, 4  ;;  %s144_s6 = int_to_ptr.vmem [resolvable:$true] %s143_s6 }
  0x29   :  { %s232_s7 = scalar_lea.vmem %s144_s6, 128  ;;  %p237_p3 = scmp.lt.s32.totalorder %s144_s6, %s144_s6 }
  0x2a   :  { %172 = vmatpush3.bf16.msra.mxu0 %v171_v5  ;;  %p233_p2 = scmp.ne.s32.totalorder %s144_s6, %s232_s7  ;;  %p238_p4 = scmp.lt.s32.totalorder %s232_s7, %s232_s7 }
  0x2b   :  { %173 = vmatprep.subr.bf16.mxu0 %v264_v0 }
  0x2c   :  { %p239_p5 = por %p238_p4, %p237_p3 }
  0x2e   :  { %175 = vmatpush3.bf16.msra.mxu0 %v174_v7  ;;  %p240_p6 = pnand %p239_p5, %p233_p2 }
  0x31   :  { %168 = vmatmul.mubr.msk.f32.vlgmr.msra.gmra.mrb[0].mxu0 %vm43_vm1, %v38_v8 }
 0x104   :  { %v113_v9 = vpop.f32.mrb[0].mxu0 }
 0x105   :  { %v117_v10 = vsel %vm43_vm1, %v113_v9, -inf  ;;  %v169_v11 = vpop.f32.mrb[1].mxu0 }
 0x106   :  { %v118_v12 = vrot.slane %v117_v10, 4 }
 0x108   :  { %v119_v13 = vmax.f32 %v117_v10, %v118_v12 }
 0x10a   :  { %v120_v14 = vrot.slane %v119_v13, 2 }
 0x10c   :  { %v121_v15 = vmax.f32 %v119_v13, %v120_v14 }
 0x10e   :  { %v122_v16 = vrot.slane %v121_v15, 1 }
 0x110   :  { %v123_v17 = vmax.f32 %v121_v15, %v122_v16 }
 0x112   :  { %v124_v18 = vsub.f32 %v113_v9, %v123_v17 }
 0x114   :  { %v125_v19 = vmul.f32 1.442695, %v124_v18 }
 0x116   :  { %184 = vpow2.f32 %v125_v19 }
 0x120   :  { %v185_v20 = vpop.eup %184 }
 0x121   :  { %v127_v21 = vsel %vm43_vm1, %v185_v20, 0.0 }
 0x122   :  { %v128_v22 = vrot.slane %v127_v21, 4 }
 0x124   :  { %v129_v23 = vadd.f32 %v128_v22, %v127_v21 }
 0x126   :  { %v130_v24 = vrot.slane %v129_v23, 2 }
 0x128   :  { %v131_v25 = vadd.f32 %v130_v24, %v129_v23 }
 0x12a   :  { %v132_v26 = vrot.slane %v131_v25, 1 }
 0x12c   :  { %v133_v27 = vadd.f32 %v132_v26, %v131_v25 }
 0x12e   :  { %186 = vrcp.f32 %v133_v27 }
 0x138   :  { %v187_v28 = vpop.eup %186 }
 0x139   :  { %v135_v29 = vmul.f32 %v187_v28, %v185_v20 }
 0x13b   :  { %136 = vst.msk [vmem:[#allocation7] sm:$0xff] %vm43_vm1, %v135_v29 }
 0x13c   :  { %243 = shalt.err (!%p240_p6)
}
 0x13d   :  { %s244_s10 = scalar_lea.hbm %s332_s2, 128 }
 0x13e   :  { %p245_p7 = scmp.ne.s32.totalorder %s332_s2, %s244_s10  ;;  %p248_p8 = scmp.lt.u32.totalorder %s244_s10, %s332_s2 }
 0x140   :  { %p250_p9 = pnand %p248_p8, %p245_p7 }
 0x142   :  { %253 = shalt.err (!%p250_p9)
}
 0x143   :  { %146 = dma.vmem_to_hbm [thread:$0]  %s144_s6, 128, %s332_s2, [#allocation4]  }
 0x144   :  { %258 = dma.done.wait [#allocation4], 128  }
 0x145   :  { %259 = vsyncadd [#allocation4], 4294967168 }
 0x146   :  { %150 = vsyncpa [#allocation3], 1 }
 0x147   :  { %151 = vsyncpa [#allocation6], 1 }
 0x148   :  { %152 = vsyncpa [#allocation4], 1 }

</bundles_post_ra>
